<compile_context>
chip_gen: v6e
topology: v6e:2x2x1
jax: 0.10.0
libtpu: 0.0.40
codegen_flags: <defaults>
</compile_context>

<pallas_src>
import jax
import jax.numpy as jnp
from jax.experimental import pallas as pl
from jax.experimental.pallas import tpu as pltpu

LANE = 128
MAX_LANE_WIDTH = 2048            # cap on the slab's last (lane) dimension
TARGET_BLOCK_BYTES = 2 << 20     # ~2 MiB per input block (safe on v5e VMEM)
SMALL_BYTES = 1 << 20            # <= this: single full-array block
MIN_BLOCKS = 4                   # >=2 blocks lets both v7x TCs share HBM BW


def _abs_kernel(x_ref, o_ref):
    o_ref[...] = jnp.abs(x_ref[...])


def _sublane(dtype) -> int:
    itemsize = jnp.dtype(dtype).itemsize
    if itemsize >= 4:
        return 8
    if itemsize == 2:
        return 16
    return 32


def _pick_lane_width(n: int) -> int:
    """Largest multiple of 128 that divides n, capped at MAX_LANE_WIDTH."""
    units = n // LANE
    k_max = min(units, MAX_LANE_WIDTH // LANE)
    for k in range(k_max, 0, -1):
        if units % k == 0:
            return k * LANE
    return LANE


def _pallas_abs_flat(x_flat):
    """|x| for a 1-D array whose size is a nonzero multiple of 128."""
    dtype = x_flat.dtype
    n = x_flat.size
    itemsize = jnp.dtype(dtype).itemsize
    sub = _sublane(dtype)

    w = _pick_lane_width(n)
    rows = n // w
    x2d = x_flat.reshape(rows, w)          # contiguous reshape: zero-copy view

    total_bytes = n * itemsize
    if total_bytes <= SMALL_BYTES or rows <= sub:
        # Single full-array block (block_shape == full dims is always legal).
        tm = rows
    else:
        # ~TARGET_BLOCK_BYTES per block, rounded to the sublane requirement
        # (dtype-scaled so bf16/int8 keep the same block byte size as f32).
        tm = max(sub, (TARGET_BLOCK_BYTES // (w * itemsize)) // sub * sub)
        # Ensure several blocks so the "parallel" grid axis shards across
        # TensorCores (v7x) instead of collapsing to a single block.
        if pl.cdiv(rows, tm) < MIN_BLOCKS:
            tm = max(sub, (pl.cdiv(rows, MIN_BLOCKS) // sub) * sub)

    grid = (pl.cdiv(rows, tm),)

    out2d = pl.pallas_call(
        _abs_kernel,
        out_shape=jax.ShapeDtypeStruct((rows, w), dtype),
        grid_spec=pltpu.PrefetchScalarGridSpec(
            num_scalar_prefetch=0,
            grid=grid,
            in_specs=[pl.BlockSpec((tm, w), lambda i: (i, 0))],
            out_specs=pl.BlockSpec((tm, w), lambda i: (i, 0)),
        ),
        compiler_params=pltpu.CompilerParams(
            dimension_semantics=("parallel",)
        ),
    )(x2d)
    return out2d.reshape(-1)


def pallas_abs(x):
    """Elementwise |x| via a Pallas TPU kernel (matches torch.abs forward)."""
    orig_shape = x.shape
    dtype = x.dtype
    n = x.size

    if n == 0 or jnp.issubdtype(dtype, jnp.complexfloating):
        # Empty tensors can't be tiled; complex abs changes dtype.
        return jnp.abs(x)
    if n < LANE:
        # Tiny input: pallas_call fixed overhead dwarfs the HBM traffic.
        return jnp.abs(x)

    flat = x.reshape(-1)
    m = (n // LANE) * LANE
    if m == n:
        # Fast path: fully 128-aligned, zero-copy reshape into the kernel.
        return _pallas_abs_flat(flat).reshape(orig_shape)

    # Unaligned: kernel on the 128-aligned prefix, plain abs on the <128-elem
    # tail.  Avoids pad/concatenate/slice passes over the whole array.
    head = _pallas_abs_flat(flat[:m])
    tail = jnp.abs(flat[m:])
    return jnp.concatenate([head, tail]).reshape(orig_shape)


if __name__ == "__main__":
    key = jax.random.PRNGKey(0)

    # Primary shape from the test suite: (2, 4, 16, 16).
    x = jax.random.normal(key, (2, 4, 16, 16), dtype=jnp.float32)
    y = pallas_abs(x)
    jax.block_until_ready(y)
    assert y.shape == x.shape and y.dtype == x.dtype
    assert jnp.allclose(y, jnp.abs(x))

    # Small extra check exercising the unaligned-tail fallback path.
    x2 = jax.random.normal(jax.random.PRNGKey(1), (3, 43), dtype=jnp.float32)
    y2 = pallas_abs(x2)
    jax.block_until_ready(y2)
    assert y2.shape == x2.shape and jnp.allclose(y2, jnp.abs(x2))

    print("KERNEL_OK")
</pallas_src>

<mosaic_0001>
module attributes {stable_mosaic.version = 11 : i64} {
  func.func @_abs_kernel(%arg0: i32, %arg1: memref<1x2048xf32, #tpu.memory_space<vmem>>, %arg2: memref<1x2048xf32, #tpu.memory_space<vmem>>) attributes {dimension_semantics = [#tpu.dimension_semantics<parallel>], iteration_bounds = array<i64: 1>, scalar_prefetch = 0 : i64, scratch_operands = 0 : i64, tpu.core_type = #tpu.core_type<tc>, window_params = [{transform_indices = @transform_0, window_bounds = array<i64: 1, 2048>}, {transform_indices = @transform_1, window_bounds = array<i64: 1, 2048>}]} {
    %c0 = arith.constant 0 : index
    %c0_0 = arith.constant 0 : index
    %0 = vector.load %arg1[%c0, %c0_0] : memref<1x2048xf32, #tpu.memory_space<vmem>>, vector<1x2048xf32>
    %1 = math.absf %0 : vector<1x2048xf32>
    %c0_1 = arith.constant 0 : index
    %c0_2 = arith.constant 0 : index
    %2 = vector.load %arg2[%c0_1, %c0_2] : memref<1x2048xf32, #tpu.memory_space<vmem>>, vector<1x2048xf32>
    tpu.vector_store %arg2[%c0_1, %c0_2], %1 {strides = array<i32>} : memref<1x2048xf32, #tpu.memory_space<vmem>>, vector<1x2048xf32>,
    return
  }
  func.func @transform_0(%arg0: i32) -> (i32, i32) {
    %c0_i32 = arith.constant 0 : i32
    %c0_i32_0 = arith.constant 0 : i32
    return %arg0, %c0_i32 : i32, i32
  }
  func.func @transform_1(%arg0: i32) -> (i32, i32) {
    %c0_i32 = arith.constant 0 : i32
    %c0_i32_0 = arith.constant 0 : i32
    return %arg0, %c0_i32 : i32, i32
  }
}

</mosaic_0001>

<bundles_post_ra>
// kernel: tpu_custom_call.1
= control target key start
LH: loop header
LB: loop body
LE: loop exit
PB: predicated region body
PF: predicated region fallthrough
CT: control target
= control target key end

     0   :  { %6 = vsyncpa [#allocation3], 0  ;;  %s106_s0 = inlined_call_operand.hbm [shape: f32[1,2048], index: 0, kind: input, shape index: {}]   ;;  %s107_s1 = inlined_call_operand.hbm [shape: f32[1,2048], index: 1, kind: output, shape index: {}]  }
   0x1   :  { %7 = vsyncpa [#allocation4], 0  ;;  %s88_s6 = smov [#allocation2]  }
   0x2   :  { %s14_s7 = sshll.u32 %s88_s6, 4  ;;  %s15_s7 = int_to_ptr.vmem [resolvable:$true] %s14_s7 }
   0x3   :  { %s52_s8 = scalar_lea.vmem %s15_s7, 256  ;;  %p57_p1 = scmp.lt.s32.totalorder %s15_s7, %s15_s7 }
   0x4   :  { %p53_p0 = scmp.ne.s32.totalorder %s15_s7, %s52_s8  ;;  %p58_p2 = scmp.lt.s32.totalorder %s52_s8, %s52_s8 }
   0x6   :  { %p59_p3 = por %p58_p2, %p57_p1 }
   0x8   :  { %p60_p4 = pnand %p59_p3, %p53_p0 }
   0xa   :  { %63 = shalt.err (!%p60_p4)
}
   0xb   :  { %17 = dma.hbm_to_vmem [thread:$0]  %s106_s0, 256, %s15_s7, [#allocation3]  }
   0xc   :  { %84 = dma.done.wait [#allocation3], 256  }
   0xd   :  { %85 = vsyncadd [#allocation3], 4294967040  ;;  %s89_s11 = smov [#allocation5]   ;;  %v21_v0 = vld [vmem:[#allocation2] sm:$0xff]  ;;  %v22_v1 = vld [vmem:[#allocation2 + $0x8] sm:$0xff] }
   0xe   :  { %s33_s12 = sshll.u32 %s89_s11, 4  ;;  %v23_v2 = vand.u32 2147483647, %v21_v0  ;;  %v24_v3 = vand.u32 2147483647, %v22_v1  ;;  %s34_s12 = int_to_ptr.vmem [resolvable:$true] %s33_s12 }
   0xf   :  { %s64_s13 = scalar_lea.vmem %s34_s12, 256  ;;  %p69_p6 = scmp.lt.s32.totalorder %s34_s12, %s34_s12 }
  0x10   :  { %25 = vst [vmem:[#allocation5] sm:$0xff] %v23_v2  ;;  %26 = vst [vmem:[#allocation5 + $0x8] sm:$0xff] %v24_v3  ;;  %p65_p5 = scmp.ne.s32.totalorder %s34_s12, %s64_s13  ;;  %p70_p7 = scmp.lt.s32.totalorder %s64_s13, %s64_s13 }
  0x12   :  { %p71_p8 = por %p70_p7, %p69_p6 }
  0x14   :  { %p72_p9 = pnand %p71_p8, %p65_p5 }
  0x16   :  { %75 = shalt.err (!%p72_p9)
}
  0x17   :  { %36 = dma.vmem_to_hbm [thread:$0]  %s34_s12, 256, %s107_s1, [#allocation4]  }
  0x18   :  { %86 = dma.done.wait [#allocation4], 256  }
  0x19   :  { %87 = vsyncadd [#allocation4], 4294967040 }
  0x1a   :  { %40 = vsyncpa [#allocation3], 1 }
  0x1b   :  { %41 = vsyncpa [#allocation4], 1 }

</bundles_post_ra>
